<compile_context>
chip_gen: v7x
topology: tpu7x:2x2x1
jax: 0.10.0
libtpu: 0.0.40
codegen_flags: <defaults>
</compile_context>

<pallas_src>
import functools

import jax
import jax.numpy as jnp
from jax.experimental import pallas as pl
from jax.experimental.pallas import tpu as pltpu


# ------------------------------------------------------------------ hardware query
def _vmem_capacity_bytes():
    try:
        return int(pltpu.get_tpu_info().vmem_capacity_bytes)
    except Exception:
        return 64 * 1024 * 1024          # conservative fallback (v7x per-TC VMEM)


# ------------------------------------------------------------------ tiled linear kernel
def _linear_kernel(x_ref, w_ref, b_ref, o_ref):
    o_ref[...] = (jnp.dot(x_ref[...], w_ref[...], preferred_element_type=jnp.float32)
                  + b_ref[...].astype(jnp.float32)).astype(o_ref.dtype)


def _fit_tile(n, candidates):
    """Tile for dim n: exact divisor if possible, the full (small) dim, or pad up."""
    for c in candidates:
        if n % c == 0:
            return c, n
    if n < candidates[-1]:
        return n, n
    t = candidates[-1]
    return t, -(-n // t) * t


def linear(x, w, b, *, out_dtype=jnp.float32, vmem_budget=40 * 1024 * 1024):
    """x: (N, K) @ w: (K, V) + b: (1, V) -> (N, V).  Tiled over (N, V), parallel grid."""
    N, K = x.shape
    V = w.shape[1]
    xs, ws = x.dtype.itemsize, w.dtype.itemsize
    os_ = jnp.dtype(out_dtype).itemsize

    # Tile candidates, shrunk until one (TN, TV) pair fits the VMEM budget (double-buffered).
    tn_cands = [512, 256, 128]
    tv_cands = [1024, 512, 256, 128]

    def _fits(tn, tv):
        return 2 * (tn * K * xs + K * tv * ws + tv * 4 + tn * tv * os_) <= vmem_budget

    while not _fits(tn_cands[0], tv_cands[0]):
        if len(tv_cands) > 1 and tv_cands[0] >= tn_cands[0]:
            tv_cands.pop(0)
        elif len(tn_cands) > 1:
            tn_cands.pop(0)
        else:
            break

    TN, Np = _fit_tile(N, tn_cands)
    TV, Vp = _fit_tile(V, tv_cands)
    if Np != N:
        x = jnp.pad(x, ((0, Np - N), (0, 0)))
    if Vp != V:
        w = jnp.pad(w, ((0, 0), (0, Vp - V)))
        b = jnp.pad(b, ((0, 0), (0, Vp - V)))

    gi, gj = Np // TN, Vp // TV
    # Keep the larger operand resident across the inner grid axis so the dominant operand is
    # read from HBM exactly once (the vocab-projection weight was previously re-streamed
    # N/TN times).
    weight_resident = K * Vp * ws >= Np * K * xs
    if weight_resident:
        grid = (gj, gi)
        x_map = lambda j, i: (i, 0)
        w_map = lambda j, i: (0, j)
        b_map = lambda j, i: (0, j)
        o_map = lambda j, i: (i, j)
    else:
        grid = (gi, gj)
        x_map = lambda i, j: (i, 0)
        w_map = lambda i, j: (0, j)
        b_map = lambda i, j: (0, j)
        o_map = lambda i, j: (i, j)

    need = 2 * (TN * K * xs + K * TV * ws + TV * 4 + TN * TV * os_)
    vmem_limit = int(min(max(need + (8 << 20), 32 << 20), 64 << 20))

    cost = pl.CostEstimate(
        flops=int(2 * Np * K * Vp),
        transcendentals=0,
        bytes_accessed=int(Np * K) * xs + int(K * Vp) * ws + int(Np * Vp) * os_)

    out = pl.pallas_call(
        _linear_kernel,
        out_shape=jax.ShapeDtypeStruct((Np, Vp), out_dtype),
        grid_spec=pltpu.PrefetchScalarGridSpec(
            num_scalar_prefetch=0,
            grid=grid,
            in_specs=[pl.BlockSpec((TN, K), x_map),
                      pl.BlockSpec((K, TV), w_map),
                      pl.BlockSpec((1, TV), b_map)],
            out_specs=pl.BlockSpec((TN, TV), o_map),
        ),
        compiler_params=pltpu.CompilerParams(
            dimension_semantics=("parallel", "parallel"),
            vmem_limit_bytes=vmem_limit),
        cost_estimate=cost,
    )(x, w, b)
    if Np != N or Vp != V:
        out = out[:N, :V]
    return out


# ------------------------------------------------------------------ fused multi-layer RNN kernel
def _make_fused_rnn_kernel(num_layers, chunk, seq_len, pad_from):
    """pad_from: first time-step index inside a chunk that can ever be padded (None = never)."""
    L = num_layers

    def kernel(*refs):
        xproj_ref = refs[0]                 # (chunk, BB, H)  precomputed x @ W_ih0 + b0
        h0_ref = refs[1]                    # (L, BB, H)
        pos = 2
        wih_refs, b_refs = [], []
        for _ in range(L - 1):
            wih_refs.append(refs[pos]); b_refs.append(refs[pos + 1]); pos += 2
        whh_refs = list(refs[pos:pos + L]); pos += L
        out_ref = refs[pos]                 # (chunk, BB, H)
        hn_ref = refs[pos + 1]              # (L, BB, H)  VMEM-resident recurrent state
        if L > 1:
            act_buf = refs[pos + 2]         # (chunk*BB, H) compute-dtype staging (layer outs)
            pre_buf = refs[pos + 3]         # (chunk*BB, H) f32 next-layer pre-activations
        else:
            act_buf = pre_buf = None

        c = pl.program_id(1)                # time-chunk index (sequential axis)
        _, BB, H = xproj_ref.shape
        cdt = whh_refs[0].dtype             # MXU compute dtype (f32 or bf16)
        t0 = c * chunk

        # First chunk of each batch block: seed the resident state from h0.
        @pl.when(c == 0)
        def _():
            hn_ref[...] = h0_ref[...].astype(hn_ref.dtype)

        for l in range(L):
            whh = whh_refs[l][...]
            h = hn_ref[l]                   # (BB, H) f32
            last = (l == L - 1)
            for t in range(chunk):          # static, fully unrolled serial recurrence
                if l == 0:
                    pre_t = xproj_ref[t].astype(jnp.float32)
                else:
                    pre_t = pre_buf[pl.ds(t * BB, BB), :]
                h_new = jnp.tanh(pre_t + jnp.dot(h.astype(cdt), whh,
                                                 preferred_element_type=jnp.float32))
                if pad_from is not None and t >= pad_from:
                    # Only the trailing steps of the *last* chunk can be padded; the select
                    # is elided for every other step.
                    h = jnp.where(t0 + t < seq_len, h_new, h)
                else:
                    h = h_new
                if last:
                    out_ref[t] = h.astype(out_ref.dtype)   # only last layer leaves the kernel
                else:
                    act_buf[pl.ds(t * BB, BB), :] = h.astype(act_buf.dtype)
            hn_ref[l] = h

            if not last:
                # Next layer's input projection: one batched matmul over the whole chunk
                # (hoisted off the serial recurrence path).
                pre_buf[...] = (jnp.dot(act_buf[...], wih_refs[l][...],
                                        preferred_element_type=jnp.float32)
                                + b_refs[l][...].astype(jnp.float32))

    return kernel


def fused_rnn(x_proj, h0, wih_rest, b_rest, whh_all, *, seq_len, chunk, out_dtype,
              act_dtype, batch_block, vmem_limit_bytes):
    """x_proj: (T_pad, B, H) precomputed layer-0 pre-activations, h0: (L, B, H) f32.
    Returns (out (T_pad, B, H) out_dtype, hn (L, B, H) f32)."""
    T_pad, B, H = x_proj.shape
    L = h0.shape[0]
    BB = batch_block
    assert B % BB == 0 and T_pad % chunk == 0
    assert BB == B or BB % 8 == 0, "batch block must be the full batch or a multiple of 8"
    nb, nc = B // BB, T_pad // chunk
    padded = (T_pad != seq_len)
    pad_from = (seq_len - (nc - 1) * chunk) if padded else None

    weight_args, weight_specs = [], []
    for l in range(1, L):
        weight_args += [wih_rest[l - 1], b_rest[l - 1]]
        # Constant index_map -> fetched once per batch block.  (pl.Buffered(1) would halve
        # their VMEM footprint; left off for lowering compatibility.)
        weight_specs += [pl.BlockSpec((H, H), lambda bb, c: (0, 0)),
                         pl.BlockSpec((1, H), lambda bb, c: (0, 0))]
    for l in range(L):
        weight_args.append(whh_all[l])
        weight_specs.append(pl.BlockSpec((H, H), lambda bb, c: (0, 0)))

    w_bytes = sum(int(w.size) * w.dtype.itemsize for w in weight_args)
    out_isz = jnp.dtype(out_dtype).itemsize
    cost = pl.CostEstimate(
        flops=int(2 * T_pad * B * H * H * (2 * L - 1)),
        transcendentals=int(T_pad * B * H * L),
        bytes_accessed=int(x_proj.size) * x_proj.dtype.itemsize
                       + int(T_pad * B * H) * out_isz
                       + 2 * int(L * B * H) * 4 + w_bytes)

    kernel = _make_fused_rnn_kernel(L, chunk, seq_len, pad_from)
    scratch = ([pltpu.VMEM((chunk * BB, H), act_dtype),
                pltpu.VMEM((chunk * BB, H), jnp.float32)] if L > 1 else [])

    return pl.pallas_call(
        kernel,
        out_shape=(jax.ShapeDtypeStruct((T_pad, B, H), out_dtype),
                   jax.ShapeDtypeStruct((L, B, H), jnp.float32)),
        grid_spec=pltpu.PrefetchScalarGridSpec(
            num_scalar_prefetch=0,
            grid=(nb, nc),
            in_specs=[pl.BlockSpec((chunk, BB, H), lambda bb, c: (c, bb, 0)),
                      pl.BlockSpec((L, BB, H), lambda bb, c: (0, bb, 0))] + weight_specs,
            out_specs=[pl.BlockSpec((chunk, BB, H), lambda bb, c: (c, bb, 0)),
                       pl.BlockSpec((L, BB, H), lambda bb, c: (0, bb, 0))],
            scratch_shapes=scratch,
        ),
        compiler_params=pltpu.CompilerParams(
            dimension_semantics=("parallel", "arbitrary"),
            vmem_limit_bytes=int(vmem_limit_bytes)),
        cost_estimate=cost,
        # Alias h0 -> hn.  Safe only because time (c) is the INNERMOST grid axis: each batch
        # block's resident hn is flushed before any other block reads its h0 slice, and
        # within a block h0 is only read at c == 0 (before the first flush).  Do not change
        # the grid order or these index_maps without revisiting this alias.
        input_output_aliases={1: 1},
    )(x_proj, h0, *weight_args)


# ------------------------------------------------------------------ sizing heuristics
def _default_batch_block(B):
    # Give the "parallel" batch grid axis >= 2 blocks for large batches (v7x has two
    # TensorCores); keep BB = B for small batches so v5e/v6e keep a full MXU M dimension.
    if B >= 256 and B % 2 == 0 and (B // 2) % 8 == 0:
        return B // 2
    return B


def _derive_chunk(T, BB, H, L, csize, budget):
    """Largest time-chunk whose double-buffered streamed blocks + scratch fit the budget."""
    w_bytes = ((L - 1) * (H * H + H) + L * H * H) * csize
    fixed = 2 * w_bytes + 4 * L * BB * H * 4                   # weights (2 bufs) + h0/hn
    per_step = BB * H * (2 * csize + 2 * csize                 # x_proj + out blocks (2 bufs)
                         + ((4 + csize) if L > 1 else 0)       # pre_buf + act_buf scratch
                         + 4)                                  # headroom for temporaries
    max_chunk = max((budget - fixed) // max(per_step, 1), 1)
    cands = [c for c in (64, 32, 16, 8) if c <= max_chunk]     # cap 64: bounded unroll size
    for c in cands:                                            # prefer no time padding
        if T % c == 0:
            return c
    for c in cands:                                            # else allow <= 25% padding
        if ((-T) % c) * 4 <= T:
            return c
    return max(min(T, 8), 1)


# ------------------------------------------------------------------ full forward
@functools.partial(jax.jit, static_argnames=("num_layers", "compute_dtype", "batch_block"))
def elman_rnn_forward(tokens, hidden, params, *, num_layers, compute_dtype=jnp.float32,
                      batch_block=None):
    """tokens (B, T) int32, hidden (num_layers, B, H) f32 -> (logits (B,T,V), hidden)."""
    B, T = tokens.shape
    cdt = jnp.dtype(compute_dtype)
    E = params["emb"].shape[1]
    H = params["w_hh"][0].shape[0]
    V = params["w_out"].shape[1]

    # Cast parameters (not the gathered activations) to the compute dtype once.
    emb_c = params["emb"].astype(cdt)
    wih = [params["w_ih"][l].astype(cdt) for l in range(num_layers)]
    whh = [params["w_hh"][l].astype(cdt) for l in range(num_layers)]
    bias = [params["b"][l] for l in range(num_layers)]
    w_out = params["w_out"].astype(cdt)

    # Time-major embedding gather (data-dependent, left to XLA): (T, B, E), no transpose of
    # the big activation tensor afterwards.
    x = jnp.take(emb_c, tokens.T, axis=0)

    # Hoisted layer-0 input projection: one big (T*B, E) @ (E, H) matmul + bias.
    x_proj = linear(x.reshape(T * B, E), wih[0], bias[0], out_dtype=cdt)
    x_proj = x_proj.reshape(T, B, H)                              # already time-major

    # Per-generation VMEM budget: v5e/v6e have 128 MiB, v7x only 64 MiB per TensorCore.
    cap = _vmem_capacity_bytes()
    budget = min(int(cap * 0.6), 80 << 20)
    vmem_limit = min(int(cap * 0.75), 96 << 20)
    BB = batch_block if batch_block is not None else _default_batch_block(B)
    chunk = _derive_chunk(T, BB, H, num_layers, cdt.itemsize, budget)
    T_pad = -(-T // chunk) * chunk
    if T_pad != T:
        x_proj = jnp.pad(x_proj, ((0, T_pad - T), (0, 0), (0, 0)))

    # TODO(synk): nn.RNN inter-layer dropout is never enabled by this module (eval semantics).
    out, hn = fused_rnn(x_proj, hidden, wih[1:], bias[1:], whh,
                        seq_len=T, chunk=chunk, out_dtype=cdt, act_dtype=cdt,
                        batch_block=BB, vmem_limit_bytes=vmem_limit)

    # Transpose the small H-sized activations (not the V-sized logits) to batch-major, then
    # the logits reshape directly to (B, T, V) with no extra HBM round trip.
    out_bt = jnp.transpose(out[:T], (1, 0, 2)).reshape(B * T, H)
    logits = linear(out_bt, w_out, params["b_out"], out_dtype=jnp.float32)
    return logits.reshape(B, T, V), hn


# ------------------------------------------------------------------ pure-JAX reference
def reference_forward(tokens, hidden, params, num_layers):
    x = jnp.take(params["emb"], tokens, axis=0)
    layer_in = jnp.transpose(x, (1, 0, 2))
    hns = []
    for l in range(num_layers):
        w_ih, w_hh, b = params["w_ih"][l], params["w_hh"][l], params["b"][l]

        def step(h, xt):
            hn = jnp.tanh(xt @ w_ih + h @ w_hh + b[0])
            return hn, hn

        hN, outs = jax.lax.scan(step, hidden[l], layer_in)
        hns.append(hN)
        layer_in = outs
    T, B, H = layer_in.shape
    logits = layer_in.reshape(T * B, H) @ params["w_out"] + params["b_out"][0]
    V = params["w_out"].shape[1]
    return jnp.transpose(logits.reshape(T, B, V), (1, 0, 2)), jnp.stack(hns, 0)


# ------------------------------------------------------------------ main
if __name__ == "__main__":
    vocab_size, embedding_dim, hidden_dim, num_layers = 64, 32, 32, 2
    batch, seq = 2, 8

    key = jax.random.PRNGKey(0)
    ks = jax.random.split(key, 4 + 4 * num_layers)

    bound = 1.0 / jnp.sqrt(hidden_dim)
    params = {
        "emb": jax.random.normal(ks[0], (vocab_size, embedding_dim), jnp.float32) * 0.1,
        "w_ih": [], "w_hh": [], "b": [],
        "w_out": jax.random.uniform(ks[1], (hidden_dim, vocab_size), jnp.float32,
                                    -bound, bound),
        "b_out": jax.random.uniform(ks[2], (1, vocab_size), jnp.float32, -bound, bound),
    }
    for l in range(num_layers):
        in_dim = embedding_dim if l == 0 else hidden_dim
        k0, k1, k2, k3 = ks[4 + 4 * l: 8 + 4 * l]
        params["w_ih"].append(jax.random.uniform(k0, (in_dim, hidden_dim), jnp.float32,
                                                 -bound, bound))
        params["w_hh"].append(jax.random.uniform(k1, (hidden_dim, hidden_dim), jnp.float32,
                                                 -bound, bound))
        b_ih = jax.random.uniform(k2, (hidden_dim,), jnp.float32, -bound, bound)
        b_hh = jax.random.uniform(k3, (hidden_dim,), jnp.float32, -bound, bound)
        params["b"].append((b_ih + b_hh).reshape(1, hidden_dim))

    tokens = jax.random.randint(ks[3], (batch, seq), 0, vocab_size, dtype=jnp.int32)
    hidden0 = jnp.zeros((num_layers, batch, hidden_dim), jnp.float32)   # init_hidden

    # f32 path (tight tolerance vs pure-JAX reference)
    logits, hidden_out = elman_rnn_forward(tokens, hidden0, params, num_layers=num_layers)
    jax.block_until_ready((logits, hidden_out))

    ref_logits, ref_hidden = reference_forward(tokens, hidden0, params, num_layers)
    assert logits.shape == (batch, seq, vocab_size)
    assert hidden_out.shape == (num_layers, batch, hidden_dim)
    assert jnp.allclose(logits, ref_logits, atol=3e-5, rtol=3e-5)
    assert jnp.allclose(hidden_out, ref_hidden, atol=3e-5, rtol=3e-5)

    # bf16 MXU path (bf16 weights + streamed activations, f32 accumulation + f32 state)
    logits_bf16, hidden_bf16 = elman_rnn_forward(tokens, hidden0, params,
                                                 num_layers=num_layers,
                                                 compute_dtype=jnp.bfloat16)
    jax.block_until_ready((logits_bf16, hidden_bf16))
    assert jnp.allclose(logits_bf16, ref_logits, atol=5e-2, rtol=5e-2)
    assert jnp.allclose(hidden_bf16, ref_hidden, atol=5e-2, rtol=5e-2)

    print("KERNEL_OK")
</pallas_src>

<mosaic_0001>
module attributes {stable_mosaic.version = 11 : i64} {
  func.func @_linear_kernel(%arg0: i32, %arg1: i32, %arg2: memref<16x32xf32, #tpu.memory_space<vmem>>, %arg3: memref<32x32xf32, #tpu.memory_space<vmem>>, %arg4: memref<1x32xf32, #tpu.memory_space<vmem>>, %arg5: memref<16x32xf32, #tpu.memory_space<vmem>>) attributes {dimension_semantics = [#tpu.dimension_semantics<parallel>, #tpu.dimension_semantics<parallel>], iteration_bounds = array<i64: 1, 1>, scalar_prefetch = 0 : i64, scratch_operands = 0 : i64, tpu.core_type = #tpu.core_type<tc>, window_params = [{transform_indices = @transform_0, window_bounds = array<i64: 16, 32>}, {transform_indices = @transform_1, window_bounds = array<i64: 32, 32>}, {transform_indices = @transform_2, window_bounds = array<i64: 1, 32>}, {transform_indices = @transform_3, window_bounds = array<i64: 16, 32>}]} {
    %c0 = arith.constant 0 : index
    %c0_0 = arith.constant 0 : index
    %0 = vector.load %arg2[%c0, %c0_0] : memref<16x32xf32, #tpu.memory_space<vmem>>, vector<16x32xf32>
    %c0_1 = arith.constant 0 : index
    %c0_2 = arith.constant 0 : index
    %1 = vector.load %arg3[%c0_1, %c0_2] : memref<32x32xf32, #tpu.memory_space<vmem>>, vector<32x32xf32>
    %cst = arith.constant dense<0.000000e+00> : vector<16x32xf32>
    %2 = tpu.matmul %0, %1, %cst {dimension_numbers = #tpu.dot_dimension_numbers<[1], [0], [0], [1], [0, 0, 1, 1], [], []>} : vector<16x32xf32>, vector<32x32xf32>, vector<16x32xf32> -> vector<16x32xf32>
    %c0_3 = arith.constant 0 : index
    %c0_4 = arith.constant 0 : index
    %3 = vector.load %arg4[%c0_3, %c0_4] : memref<1x32xf32, #tpu.memory_space<vmem>>, vector<1x32xf32>
    %4 = vector.broadcast %3 : vector<1x32xf32> to vector<16x32xf32>
    %5 = arith.addf %2, %4 : vector<16x32xf32>
    %c0_5 = arith.constant 0 : index
    %c0_6 = arith.constant 0 : index
    %6 = vector.load %arg5[%c0_5, %c0_6] : memref<16x32xf32, #tpu.memory_space<vmem>>, vector<16x32xf32>
    tpu.vector_store %arg5[%c0_5, %c0_6], %5 {strides = array<i32>} : memref<16x32xf32, #tpu.memory_space<vmem>>, vector<16x32xf32>,
    return
  }
  func.func @transform_0(%arg0: i32, %arg1: i32) -> (i32, i32) {
    %c0_i32 = arith.constant 0 : i32
    %c0_i32_0 = arith.constant 0 : i32
    return %arg1, %c0_i32 : i32, i32
  }
  func.func @transform_1(%arg0: i32, %arg1: i32) -> (i32, i32) {
    %c0_i32 = arith.constant 0 : i32
    %c0_i32_0 = arith.constant 0 : i32
    return %c0_i32, %arg0 : i32, i32
  }
  func.func @transform_2(%arg0: i32, %arg1: i32) -> (i32, i32) {
    %c0_i32 = arith.constant 0 : i32
    %c0_i32_0 = arith.constant 0 : i32
    return %c0_i32, %arg0 : i32, i32
  }
  func.func @transform_3(%arg0: i32, %arg1: i32) -> (i32, i32) {
    %c0_i32 = arith.constant 0 : i32
    return %arg1, %arg0 : i32, i32
  }
}

module attributes {stable_mosaic.version = 11 : i64} {
  func.func @_linear_kernel(%arg0: i32, %arg1: i32, %arg2: memref<16x32xf32, #tpu.memory_space<vmem>>, %arg3: memref<32x64xf32, #tpu.memory_space<vmem>>, %arg4: memref<1x64xf32, #tpu.memory_space<vmem>>, %arg5: memref<16x64xf32, #tpu.memory_space<vmem>>) attributes {dimension_semantics = [#tpu.dimension_semantics<parallel>, #tpu.dimension_semantics<parallel>], iteration_bounds = array<i64: 1, 1>, scalar_prefetch = 0 : i64, scratch_operands = 0 : i64, tpu.core_type = #tpu.core_type<tc>, window_params = [{transform_indices = @transform_0, window_bounds = array<i64: 16, 32>}, {transform_indices = @transform_1, window_bounds = array<i64: 32, 64>}, {transform_indices = @transform_2, window_bounds = array<i64: 1, 64>}, {transform_indices = @transform_3, window_bounds = array<i64: 16, 64>}]} {
    %c0 = arith.constant 0 : index
    %c0_0 = arith.constant 0 : index
    %0 = vector.load %arg2[%c0, %c0_0] : memref<16x32xf32, #tpu.memory_space<vmem>>, vector<16x32xf32>
    %c0_1 = arith.constant 0 : index
    %c0_2 = arith.constant 0 : index
    %1 = vector.load %arg3[%c0_1, %c0_2] : memref<32x64xf32, #tpu.memory_space<vmem>>, vector<32x64xf32>
    %cst = arith.constant dense<0.000000e+00> : vector<16x64xf32>
    %2 = tpu.matmul %0, %1, %cst {dimension_numbers = #tpu.dot_dimension_numbers<[1], [0], [0], [1], [0, 0, 1, 1], [], []>} : vector<16x32xf32>, vector<32x64xf32>, vector<16x64xf32> -> vector<16x64xf32>
    %c0_3 = arith.constant 0 : index
    %c0_4 = arith.constant 0 : index
    %3 = vector.load %arg4[%c0_3, %c0_4] : memref<1x64xf32, #tpu.memory_space<vmem>>, vector<1x64xf32>
    %4 = vector.broadcast %3 : vector<1x64xf32> to vector<16x64xf32>
    %5 = arith.addf %2, %4 : vector<16x64xf32>
    %c0_5 = arith.constant 0 : index
    %c0_6 = arith.constant 0 : index
    %6 = vector.load %arg5[%c0_5, %c0_6] : memref<16x64xf32, #tpu.memory_space<vmem>>, vector<16x64xf32>
    tpu.vector_store %arg5[%c0_5, %c0_6], %5 {strides = array<i32>} : memref<16x64xf32, #tpu.memory_space<vmem>>, vector<16x64xf32>,
    return
  }
  func.func @transform_0(%arg0: i32, %arg1: i32) -> (i32, i32) {
    %c0_i32 = arith.constant 0 : i32
    %c0_i32_0 = arith.constant 0 : i32
    return %arg1, %c0_i32 : i32, i32
  }
  func.func @transform_1(%arg0: i32, %arg1: i32) -> (i32, i32) {
    %c0_i32 = arith.constant 0 : i32
    %c0_i32_0 = arith.constant 0 : i32
    return %c0_i32, %arg0 : i32, i32
  }
  func.func @transform_2(%arg0: i32, %arg1: i32) -> (i32, i32) {
    %c0_i32 = arith.constant 0 : i32
    %c0_i32_0 = arith.constant 0 : i32
    return %c0_i32, %arg0 : i32, i32
  }
  func.func @transform_3(%arg0: i32, %arg1: i32) -> (i32, i32) {
    %c0_i32 = arith.constant 0 : i32
    return %arg1, %arg0 : i32, i32
  }
}

module attributes {stable_mosaic.version = 11 : i64} {
  func.func @kernel(%arg0: i32, %arg1: i32, %arg2: memref<8x2x32xf32, #tpu.memory_space<vmem>>, %arg3: memref<2x2x32xf32, #tpu.memory_space<vmem>>, %arg4: memref<32x32xf32, #tpu.memory_space<vmem>>, %arg5: memref<1x32xf32, #tpu.memory_space<vmem>>, %arg6: memref<32x32xf32, #tpu.memory_space<vmem>>, %arg7: memref<32x32xf32, #tpu.memory_space<vmem>>, %arg8: memref<8x2x32xf32, #tpu.memory_space<vmem>>, %arg9: memref<2x2x32xf32, #tpu.memory_space<vmem>>, %arg10: memref<16x32xf32, #tpu.memory_space<vmem>>, %arg11: memref<16x32xf32, #tpu.memory_space<vmem>>) attributes {dimension_semantics = [#tpu.dimension_semantics<parallel>, #tpu.dimension_semantics<arbitrary>], iteration_bounds = array<i64: 1, 1>, scalar_prefetch = 0 : i64, scratch_operands = 2 : i64, tpu.core_type = #tpu.core_type<tc>, window_params = [{transform_indices = @transform_0, window_bounds = array<i64: 8, 2, 32>}, {transform_indices = @transform_1, window_bounds = array<i64: 2, 2, 32>}, {pipeline_mode = #tpu.pipeline_mode<synchronous>, transform_indices = @transform_2, window_bounds = array<i64: 32, 32>}, {pipeline_mode = #tpu.pipeline_mode<synchronous>, transform_indices = @transform_3, window_bounds = array<i64: 1, 32>}, {pipeline_mode = #tpu.pipeline_mode<synchronous>, transform_indices = @transform_4, window_bounds = array<i64: 32, 32>}, {pipeline_mode = #tpu.pipeline_mode<synchronous>, transform_indices = @transform_5, window_bounds = array<i64: 32, 32>}, {transform_indices = @transform_6, window_bounds = array<i64: 8, 2, 32>}, {transform_indices = @transform_7, window_bounds = array<i64: 2, 2, 32>}]} {
    %c0_i32 = arith.constant 0 : i32
    %0 = arith.cmpi eq, %arg1, %c0_i32 : i32
    %1 = arith.extui %0 : i1 to i32
    %c0_i32_0 = arith.constant 0 : i32
    %2 = arith.cmpi ne, %1, %c0_i32_0 : i32
    scf.if %2 {
      %c0_109 = arith.constant 0 : index
      %c0_110 = arith.constant 0 : index
      %c0_111 = arith.constant 0 : index
      %126 = vector.load %arg3[%c0_109, %c0_110, %c0_111] : memref<2x2x32xf32, #tpu.memory_space<vmem>>, vector<2x2x32xf32>
      %c0_112 = arith.constant 0 : index
      %c0_113 = arith.constant 0 : index
      %c0_114 = arith.constant 0 : index
      %127 = vector.load %arg9[%c0_112, %c0_113, %c0_114] : memref<2x2x32xf32, #tpu.memory_space<vmem>>, vector<2x2x32xf32>
      tpu.vector_store %arg9[%c0_112, %c0_113, %c0_114], %126 {strides = array<i32>} : memref<2x2x32xf32, #tpu.memory_space<vmem>>, vector<2x2x32xf32>,
    } else {
    }
    %c0 = arith.constant 0 : index
    %c0_1 = arith.constant 0 : index
    %3 = vector.load %arg6[%c0, %c0_1] : memref<32x32xf32, #tpu.memory_space<vmem>>, vector<32x32xf32>
    %c0_2 = arith.constant 0 : index
    %c0_3 = arith.constant 0 : index
    %c0_4 = arith.constant 0 : index
    %4 = vector.load %arg9[%c0_2, %c0_3, %c0_4] : memref<2x2x32xf32, #tpu.memory_space<vmem>>, vector<1x2x32xf32>
    %5 = vector.shape_cast %4 : vector<1x2x32xf32> to vector<2x32xf32>
    %c0_5 = arith.constant 0 : index
    %c0_6 = arith.constant 0 : index
    %c0_7 = arith.constant 0 : index
    %6 = vector.load %arg2[%c0_5, %c0_6, %c0_7] : memref<8x2x32xf32, #tpu.memory_space<vmem>>, vector<1x2x32xf32>
    %7 = vector.shape_cast %6 : vector<1x2x32xf32> to vector<2x32xf32>
    %cst = arith.constant dense<0.000000e+00> : vector<2x32xf32>
    %8 = tpu.matmul %5, %3, %cst {dimension_numbers = #tpu.dot_dimension_numbers<[1], [0], [0], [1], [0, 0, 1, 1], [], []>} : vector<2x32xf32>, vector<32x32xf32>, vector<2x32xf32> -> vector<2x32xf32>
    %9 = arith.addf %7, %8 : vector<2x32xf32>
    %10 = math.tanh %9 : vector<2x32xf32>
    %c0_8 = arith.constant 0 : index
    %c0_9 = arith.constant 0 : index
    %11 = vector.load %arg10[%c0_8, %c0_9] : memref<16x32xf32, #tpu.memory_space<vmem>>, vector<2x32xf32>
    tpu.vector_store %arg10[%c0_8, %c0_9], %10 {strides = array<i32>} : memref<16x32xf32, #tpu.memory_space<vmem>>, vector<2x32xf32>,
    %c1 = arith.constant 1 : index
    %c0_10 = arith.constant 0 : index
    %c0_11 = arith.constant 0 : index
    %12 = vector.load %arg2[%c1, %c0_10, %c0_11] : memref<8x2x32xf32, #tpu.memory_space<vmem>>, vector<1x2x32xf32>
    %13 = vector.shape_cast %12 : vector<1x2x32xf32> to vector<2x32xf32>
    %cst_12 = arith.constant dense<0.000000e+00> : vector<2x32xf32>
    %14 = tpu.matmul %10, %3, %cst_12 {dimension_numbers = #tpu.dot_dimension_numbers<[1], [0], [0], [1], [0, 0, 1, 1], [], []>} : vector<2x32xf32>, vector<32x32xf32>, vector<2x32xf32> -> vector<2x32xf32>
    %15 = arith.addf %13, %14 : vector<2x32xf32>
    %16 = math.tanh %15 : vector<2x32xf32>
    %c2 = arith.constant 2 : index
    %c0_13 = arith.constant 0 : index
    %17 = vector.load %arg10[%c2, %c0_13] : memref<16x32xf32, #tpu.memory_space<vmem>>, vector<2x32xf32>
    tpu.vector_store %arg10[%c2, %c0_13], %16 {strides = array<i32>} : memref<16x32xf32, #tpu.memory_space<vmem>>, vector<2x32xf32>,
    %c2_14 = arith.constant 2 : index
    %c0_15 = arith.constant 0 : index
    %c0_16 = arith.constant 0 : index
    %18 = vector.load %arg2[%c2_14, %c0_15, %c0_16] : memref<8x2x32xf32, #tpu.memory_space<vmem>>, vector<1x2x32xf32>
    %19 = vector.shape_cast %18 : vector<1x2x32xf32> to vector<2x32xf32>
    %cst_17 = arith.constant dense<0.000000e+00> : vector<2x32xf32>
    %20 = tpu.matmul %16, %3, %cst_17 {dimension_numbers = #tpu.dot_dimension_numbers<[1], [0], [0], [1], [0, 0, 1, 1], [], []>} : vector<2x32xf32>, vector<32x32xf32>, vector<2x32xf32> -> vector<2x32xf32>
    %21 = arith.addf %19, %20 : vector<2x32xf32>
    %22 = math.tanh %21 : vector<2x32xf32>
    %c4 = arith.constant 4 : index
    %c0_18 = arith.constant 0 : index
    %23 = vector.load %arg10[%c4, %c0_18] : memref<16x32xf32, #tpu.memory_space<vmem>>, vector<2x32xf32>
    tpu.vector_store %arg10[%c4, %c0_18], %22 {strides = array<i32>} : memref<16x32xf32, #tpu.memory_space<vmem>>, vector<2x32xf32>,
    %c3 = arith.constant 3 : index
    %c0_19 = arith.constant 0 : index
    %c0_20 = arith.constant 0 : index
    %24 = vector.load %arg2[%c3, %c0_19, %c0_20] : memref<8x2x32xf32, #tpu.memory_space<vmem>>, vector<1x2x32xf32>
    %25 = vector.shape_cast %24 : vector<1x2x32xf32> to vector<2x32xf32>
    %cst_21 = arith.constant dense<0.000000e+00> : vector<2x32xf32>
    %26 = tpu.matmul %22, %3, %cst_21 {dimension_numbers = #tpu.dot_dimension_numbers<[1], [0], [0], [1], [0, 0, 1, 1], [], []>} : vector<2x32xf32>, vector<32x32xf32>, vector<2x32xf32> -> vector<2x32xf32>
    %27 = arith.addf %25, %26 : vector<2x32xf32>
    %28 = math.tanh %27 : vector<2x32xf32>
    %c6 = arith.constant 6 : index
    %c0_22 = arith.constant 0 : index
    %29 = vector.load %arg10[%c6, %c0_22] : memref<16x32xf32, #tpu.memory_space<vmem>>, vector<2x32xf32>
    tpu.vector_store %arg10[%c6, %c0_22], %28 {strides = array<i32>} : memref<16x32xf32, #tpu.memory_space<vmem>>, vector<2x32xf32>,
    %c4_23 = arith.constant 4 : index
    %c0_24 = arith.constant 0 : index
    %c0_25 = arith.constant 0 : index
    %30 = vector.load %arg2[%c4_23, %c0_24, %c0_25] : memref<8x2x32xf32, #tpu.memory_space<vmem>>, vector<1x2x32xf32>
    %31 = vector.shape_cast %30 : vector<1x2x32xf32> to vector<2x32xf32>
    %cst_26 = arith.constant dense<0.000000e+00> : vector<2x32xf32>
    %32 = tpu.matmul %28, %3, %cst_26 {dimension_numbers = #tpu.dot_dimension_numbers<[1], [0], [0], [1], [0, 0, 1, 1], [], []>} : vector<2x32xf32>, vector<32x32xf32>, vector<2x32xf32> -> vector<2x32xf32>
    %33 = arith.addf %31, %32 : vector<2x32xf32>
    %34 = math.tanh %33 : vector<2x32xf32>
    %c8 = arith.constant 8 : index
    %c0_27 = arith.constant 0 : index
    %35 = vector.load %arg10[%c8, %c0_27] : memref<16x32xf32, #tpu.memory_space<vmem>>, vector<2x32xf32>
    tpu.vector_store %arg10[%c8, %c0_27], %34 {strides = array<i32>} : memref<16x32xf32, #tpu.memory_space<vmem>>, vector<2x32xf32>,
    %c5 = arith.constant 5 : index
    %c0_28 = arith.constant 0 : index
    %c0_29 = arith.constant 0 : index
    %36 = vector.load %arg2[%c5, %c0_28, %c0_29] : memref<8x2x32xf32, #tpu.memory_space<vmem>>, vector<1x2x32xf32>
    %37 = vector.shape_cast %36 : vector<1x2x32xf32> to vector<2x32xf32>
    %cst_30 = arith.constant dense<0.000000e+00> : vector<2x32xf32>
    %38 = tpu.matmul %34, %3, %cst_30 {dimension_numbers = #tpu.dot_dimension_numbers<[1], [0], [0], [1], [0, 0, 1, 1], [], []>} : vector<2x32xf32>, vector<32x32xf32>, vector<2x32xf32> -> vector<2x32xf32>
    %39 = arith.addf %37, %38 : vector<2x32xf32>
    %40 = math.tanh %39 : vector<2x32xf32>
    %c10 = arith.constant 10 : index
    %c0_31 = arith.constant 0 : index
    %41 = vector.load %arg10[%c10, %c0_31] : memref<16x32xf32, #tpu.memory_space<vmem>>, vector<2x32xf32>
    tpu.vector_store %arg10[%c10, %c0_31], %40 {strides = array<i32>} : memref<16x32xf32, #tpu.memory_space<vmem>>, vector<2x32xf32>,
    %c6_32 = arith.constant 6 : index
    %c0_33 = arith.constant 0 : index
    %c0_34 = arith.constant 0 : index
    %42 = vector.load %arg2[%c6_32, %c0_33, %c0_34] : memref<8x2x32xf32, #tpu.memory_space<vmem>>, vector<1x2x32xf32>
    %43 = vector.shape_cast %42 : vector<1x2x32xf32> to vector<2x32xf32>
    %cst_35 = arith.constant dense<0.000000e+00> : vector<2x32xf32>
    %44 = tpu.matmul %40, %3, %cst_35 {dimension_numbers = #tpu.dot_dimension_numbers<[1], [0], [0], [1], [0, 0, 1, 1], [], []>} : vector<2x32xf32>, vector<32x32xf32>, vector<2x32xf32> -> vector<2x32xf32>
    %45 = arith.addf %43, %44 : vector<2x32xf32>
    %46 = math.tanh %45 : vector<2x32xf32>
    %c12 = arith.constant 12 : index
    %c0_36 = arith.constant 0 : index
    %47 = vector.load %arg10[%c12, %c0_36] : memref<16x32xf32, #tpu.memory_space<vmem>>, vector<2x32xf32>
    tpu.vector_store %arg10[%c12, %c0_36], %46 {strides = array<i32>} : memref<16x32xf32, #tpu.memory_space<vmem>>, vector<2x32xf32>,
    %c7 = arith.constant 7 : index
    %c0_37 = arith.constant 0 : index
    %c0_38 = arith.constant 0 : index
    %48 = vector.load %arg2[%c7, %c0_37, %c0_38] : memref<8x2x32xf32, #tpu.memory_space<vmem>>, vector<1x2x32xf32>
    %49 = vector.shape_cast %48 : vector<1x2x32xf32> to vector<2x32xf32>
    %cst_39 = arith.constant dense<0.000000e+00> : vector<2x32xf32>
    %50 = tpu.matmul %46, %3, %cst_39 {dimension_numbers = #tpu.dot_dimension_numbers<[1], [0], [0], [1], [0, 0, 1, 1], [], []>} : vector<2x32xf32>, vector<32x32xf32>, vector<2x32xf32> -> vector<2x32xf32>
    %51 = arith.addf %49, %50 : vector<2x32xf32>
    %52 = math.tanh %51 : vector<2x32xf32>
    %c14 = arith.constant 14 : index
    %c0_40 = arith.constant 0 : index
    %53 = vector.load %arg10[%c14, %c0_40] : memref<16x32xf32, #tpu.memory_space<vmem>>, vector<2x32xf32>
    tpu.vector_store %arg10[%c14, %c0_40], %52 {strides = array<i32>} : memref<16x32xf32, #tpu.memory_space<vmem>>, vector<2x32xf32>,
    %c0_41 = arith.constant 0 : index
    %c0_42 = arith.constant 0 : index
    %c0_43 = arith.constant 0 : index
    %54 = vector.load %arg9[%c0_41, %c0_42, %c0_43] : memref<2x2x32xf32, #tpu.memory_space<vmem>>, vector<1x2x32xf32>
    %55 = vector.shape_cast %54 : vector<1x2x32xf32> to vector<2x32xf32>
    %56 = vector.shape_cast %52 : vector<2x32xf32> to vector<1x2x32xf32>
    tpu.vector_store %arg9[%c0_41, %c0_42, %c0_43], %56 {strides = array<i32>} : memref<2x2x32xf32, #tpu.memory_space<vmem>>, vector<1x2x32xf32>,
    %c0_44 = arith.constant 0 : index
    %c0_45 = arith.constant 0 : index
    %57 = vector.load %arg10[%c0_44, %c0_45] : memref<16x32xf32, #tpu.memory_space<vmem>>, vector<16x32xf32>
    %c0_46 = arith.constant 0 : index
    %c0_47 = arith.constant 0 : index
    %58 = vector.load %arg4[%c0_46, %c0_47] : memref<32x32xf32, #tpu.memory_space<vmem>>, vector<32x32xf32>
    %cst_48 = arith.constant dense<0.000000e+00> : vector<16x32xf32>
    %59 = tpu.matmul %57, %58, %cst_48 {dimension_numbers = #tpu.dot_dimension_numbers<[1], [0], [0], [1], [0, 0, 1, 1], [], []>} : vector<16x32xf32>, vector<32x32xf32>, vector<16x32xf32> -> vector<16x32xf32>
    %c0_49 = arith.constant 0 : index
    %c0_50 = arith.constant 0 : index
    %60 = vector.load %arg5[%c0_49, %c0_50] : memref<1x32xf32, #tpu.memory_space<vmem>>, vector<1x32xf32>
    %61 = vector.broadcast %60 : vector<1x32xf32> to vector<16x32xf32>
    %62 = arith.addf %59, %61 : vector<16x32xf32>
    %c0_51 = arith.constant 0 : index
    %c0_52 = arith.constant 0 : index
    %63 = vector.load %arg11[%c0_51, %c0_52] : memref<16x32xf32, #tpu.memory_space<vmem>>, vector<16x32xf32>
    tpu.vector_store %arg11[%c0_51, %c0_52], %62 {strides = array<i32>} : memref<16x32xf32, #tpu.memory_space<vmem>>, vector<16x32xf32>,
    %c0_53 = arith.constant 0 : index
    %c0_54 = arith.constant 0 : index
    %64 = vector.load %arg7[%c0_53, %c0_54] : memref<32x32xf32, #tpu.memory_space<vmem>>, vector<32x32xf32>
    %c1_55 = arith.constant 1 : index
    %c0_56 = arith.constant 0 : index
    %c0_57 = arith.constant 0 : index
    %65 = vector.load %arg9[%c1_55, %c0_56, %c0_57] : memref<2x2x32xf32, #tpu.memory_space<vmem>>, vector<1x2x32xf32>
    %66 = vector.shape_cast %65 : vector<1x2x32xf32> to vector<2x32xf32>
    %c0_58 = arith.constant 0 : index
    %c0_59 = arith.constant 0 : index
    %67 = vector.load %arg11[%c0_58, %c0_59] : memref<16x32xf32, #tpu.memory_space<vmem>>, vector<2x32xf32>
    %cst_60 = arith.constant dense<0.000000e+00> : vector<2x32xf32>
    %68 = tpu.matmul %66, %64, %cst_60 {dimension_numbers = #tpu.dot_dimension_numbers<[1], [0], [0], [1], [0, 0, 1, 1], [], []>} : vector<2x32xf32>, vector<32x32xf32>, vector<2x32xf32> -> vector<2x32xf32>
    %69 = arith.addf %67, %68 : vector<2x32xf32>
    %70 = math.tanh %69 : vector<2x32xf32>
    %c0_61 = arith.constant 0 : index
    %c0_62 = arith.constant 0 : index
    %c0_63 = arith.constant 0 : index
    %71 = vector.load %arg8[%c0_61, %c0_62, %c0_63] : memref<8x2x32xf32, #tpu.memory_space<vmem>>, vector<1x2x32xf32>
    %72 = vector.shape_cast %71 : vector<1x2x32xf32> to vector<2x32xf32>
    %73 = vector.shape_cast %70 : vector<2x32xf32> to vector<1x2x32xf32>
    tpu.vector_store %arg8[%c0_61, %c0_62, %c0_63], %73 {strides = array<i32>} : memref<8x2x32xf32, #tpu.memory_space<vmem>>, vector<1x2x32xf32>,
    %c2_64 = arith.constant 2 : index
    %c0_65 = arith.constant 0 : index
    %74 = vector.load %arg11[%c2_64, %c0_65] : memref<16x32xf32, #tpu.memory_space<vmem>>, vector<2x32xf32>
    %cst_66 = arith.constant dense<0.000000e+00> : vector<2x32xf32>
    %75 = tpu.matmul %70, %64, %cst_66 {dimension_numbers = #tpu.dot_dimension_numbers<[1], [0], [0], [1], [0, 0, 1, 1], [], []>} : vector<2x32xf32>, vector<32x32xf32>, vector<2x32xf32> -> vector<2x32xf32>
    %76 = arith.addf %74, %75 : vector<2x32xf32>
    %77 = math.tanh %76 : vector<2x32xf32>
    %c1_67 = arith.constant 1 : index
    %c0_68 = arith.constant 0 : index
    %c0_69 = arith.constant 0 : index
    %78 = vector.load %arg8[%c1_67, %c0_68, %c0_69] : memref<8x2x32xf32, #tpu.memory_space<vmem>>, vector<1x2x32xf32>
    %79 = vector.shape_cast %78 : vector<1x2x32xf32> to vector<2x32xf32>
    %80 = vector.shape_cast %77 : vector<2x32xf32> to vector<1x2x32xf32>
    tpu.vector_store %arg8[%c1_67, %c0_68, %c0_69], %80 {strides = array<i32>} : memref<8x2x32xf32, #tpu.memory_space<vmem>>, vector<1x2x32xf32>,
    %c4_70 = arith.constant 4 : index
    %c0_71 = arith.constant 0 : index
    %81 = vector.load %arg11[%c4_70, %c0_71] : memref<16x32xf32, #tpu.memory_space<vmem>>, vector<2x32xf32>
    %cst_72 = arith.constant dense<0.000000e+00> : vector<2x32xf32>
    %82 = tpu.matmul %77, %64, %cst_72 {dimension_numbers = #tpu.dot_dimension_numbers<[1], [0], [0], [1], [0, 0, 1, 1], [], []>} : vector<2x32xf32>, vector<32x32xf32>, vector<2x32xf32> -> vector<2x32xf32>
    %83 = arith.addf %81, %82 : vector<2x32xf32>
    %84 = math.tanh %83 : vector<2x32xf32>
    %c2_73 = arith.constant 2 : index
    %c0_74 = arith.constant 0 : index
    %c0_75 = arith.constant 0 : index
    %85 = vector.load %arg8[%c2_73, %c0_74, %c0_75] : memref<8x2x32xf32, #tpu.memory_space<vmem>>, vector<1x2x32xf32>
    %86 = vector.shape_cast %85 : vector<1x2x32xf32> to vector<2x32xf32>
    %87 = vector.shape_cast %84 : vector<2x32xf32> to vector<1x2x32xf32>
    tpu.vector_store %arg8[%c2_73, %c0_74, %c0_75], %87 {strides = array<i32>} : memref<8x2x32xf32, #tpu.memory_space<vmem>>, vector<1x2x32xf32>,
    %c6_76 = arith.constant 6 : index
    %c0_77 = arith.constant 0 : index
    %88 = vector.load %arg11[%c6_76, %c0_77] : memref<16x32xf32, #tpu.memory_space<vmem>>, vector<2x32xf32>
    %cst_78 = arith.constant dense<0.000000e+00> : vector<2x32xf32>
    %89 = tpu.matmul %84, %64, %cst_78 {dimension_numbers = #tpu.dot_dimension_numbers<[1], [0], [0], [1], [0, 0, 1, 1], [], []>} : vector<2x32xf32>, vector<32x32xf32>, vector<2x32xf32> -> vector<2x32xf32>
    %90 = arith.addf %88, %89 : vector<2x32xf32>
    %91 = math.tanh %90 : vector<2x32xf32>
    %c3_79 = arith.constant 3 : index
    %c0_80 = arith.constant 0 : index
    %c0_81 = arith.constant 0 : index
    %92 = vector.load %arg8[%c3_79, %c0_80, %c0_81] : memref<8x2x32xf32, #tpu.memory_space<vmem>>, vector<1x2x32xf32>
    %93 = vector.shape_cast %92 : vector<1x2x32xf32> to vector<2x32xf32>
    %94 = vector.shape_cast %91 : vector<2x32xf32> to vector<1x2x32xf32>
    tpu.vector_store %arg8[%c3_79, %c0_80, %c0_81], %94 {strides = array<i32>} : memref<8x2x32xf32, #tpu.memory_space<vmem>>, vector<1x2x32xf32>,
    %c8_82 = arith.constant 8 : index
    %c0_83 = arith.constant 0 : index
    %95 = vector.load %arg11[%c8_82, %c0_83] : memref<16x32xf32, #tpu.memory_space<vmem>>, vector<2x32xf32>
    %cst_84 = arith.constant dense<0.000000e+00> : vector<2x32xf32>
    %96 = tpu.matmul %91, %64, %cst_84 {dimension_numbers = #tpu.dot_dimension_numbers<[1], [0], [0], [1], [0, 0, 1, 1], [], []>} : vector<2x32xf32>, vector<32x32xf32>, vector<2x32xf32> -> vector<2x32xf32>
    %97 = arith.addf %95, %96 : vector<2x32xf32>
    %98 = math.tanh %97 : vector<2x32xf32>
    %c4_85 = arith.constant 4 : index
    %c0_86 = arith.constant 0 : index
    %c0_87 = arith.constant 0 : index
    %99 = vector.load %arg8[%c4_85, %c0_86, %c0_87] : memref<8x2x32xf32, #tpu.memory_space<vmem>>, vector<1x2x32xf32>
    %100 = vector.shape_cast %99 : vector<1x2x32xf32> to vector<2x32xf32>
    %101 = vector.shape_cast %98 : vector<2x32xf32> to vector<1x2x32xf32>
    tpu.vector_store %arg8[%c4_85, %c0_86, %c0_87], %101 {strides = array<i32>} : memref<8x2x32xf32, #tpu.memory_space<vmem>>, vector<1x2x32xf32>,
    %c10_88 = arith.constant 10 : index
    %c0_89 = arith.constant 0 : index
    %102 = vector.load %arg11[%c10_88, %c0_89] : memref<16x32xf32, #tpu.memory_space<vmem>>, vector<2x32xf32>
    %cst_90 = arith.constant dense<0.000000e+00> : vector<2x32xf32>
    %103 = tpu.matmul %98, %64, %cst_90 {dimension_numbers = #tpu.dot_dimension_numbers<[1], [0], [0], [1], [0, 0, 1, 1], [], []>} : vector<2x32xf32>, vector<32x32xf32>, vector<2x32xf32> -> vector<2x32xf32>
    %104 = arith.addf %102, %103 : vector<2x32xf32>
    %105 = math.tanh %104 : vector<2x32xf32>
    %c5_91 = arith.constant 5 : index
    %c0_92 = arith.constant 0 : index
    %c0_93 = arith.constant 0 : index
    %106 = vector.load %arg8[%c5_91, %c0_92, %c0_93] : memref<8x2x32xf32, #tpu.memory_space<vmem>>, vector<1x2x32xf32>
    %107 = vector.shape_cast %106 : vector<1x2x32xf32> to vector<2x32xf32>
    %108 = vector.shape_cast %105 : vector<2x32xf32> to vector<1x2x32xf32>
    tpu.vector_store %arg8[%c5_91, %c0_92, %c0_93], %108 {strides = array<i32>} : memref<8x2x32xf32, #tpu.memory_space<vmem>>, vector<1x2x32xf32>,
    %c12_94 = arith.constant 12 : index
    %c0_95 = arith.constant 0 : index
    %109 = vector.load %arg11[%c12_94, %c0_95] : memref<16x32xf32, #tpu.memory_space<vmem>>, vector<2x32xf32>
    %cst_96 = arith.constant dense<0.000000e+00> : vector<2x32xf32>
    %110 = tpu.matmul %105, %64, %cst_96 {dimension_numbers = #tpu.dot_dimension_numbers<[1], [0], [0], [1], [0, 0, 1, 1], [], []>} : vector<2x32xf32>, vector<32x32xf32>, vector<2x32xf32> -> vector<2x32xf32>
    %111 = arith.addf %109, %110 : vector<2x32xf32>
    %112 = math.tanh %111 : vector<2x32xf32>
    %c6_97 = arith.constant 6 : index
    %c0_98 = arith.constant 0 : index
    %c0_99 = arith.constant 0 : index
    %113 = vector.load %arg8[%c6_97, %c0_98, %c0_99] : memref<8x2x32xf32, #tpu.memory_space<vmem>>, vector<1x2x32xf32>
    %114 = vector.shape_cast %113 : vector<1x2x32xf32> to vector<2x32xf32>
    %115 = vector.shape_cast %112 : vector<2x32xf32> to vector<1x2x32xf32>
    tpu.vector_store %arg8[%c6_97, %c0_98, %c0_99], %115 {strides = array<i32>} : memref<8x2x32xf32, #tpu.memory_space<vmem>>, vector<1x2x32xf32>,
    %c14_100 = arith.constant 14 : index
    %c0_101 = arith.constant 0 : index
    %116 = vector.load %arg11[%c14_100, %c0_101] : memref<16x32xf32, #tpu.memory_space<vmem>>, vector<2x32xf32>
    %cst_102 = arith.constant dense<0.000000e+00> : vector<2x32xf32>
    %117 = tpu.matmul %112, %64, %cst_102 {dimension_numbers = #tpu.dot_dimension_numbers<[1], [0], [0], [1], [0, 0, 1, 1], [], []>} : vector<2x32xf32>, vector<32x32xf32>, vector<2x32xf32> -> vector<2x32xf32>
    %118 = arith.addf %116, %117 : vector<2x32xf32>
    %119 = math.tanh %118 : vector<2x32xf32>
    %c7_103 = arith.constant 7 : index
    %c0_104 = arith.constant 0 : index
    %c0_105 = arith.constant 0 : index
    %120 = vector.load %arg8[%c7_103, %c0_104, %c0_105] : memref<8x2x32xf32, #tpu.memory_space<vmem>>, vector<1x2x32xf32>
    %121 = vector.shape_cast %120 : vector<1x2x32xf32> to vector<2x32xf32>
    %122 = vector.shape_cast %119 : vector<2x32xf32> to vector<1x2x32xf32>
    tpu.vector_store %arg8[%c7_103, %c0_104, %c0_105], %122 {strides = array<i32>} : memref<8x2x32xf32, #tpu.memory_space<vmem>>, vector<1x2x32xf32>,
    %c1_106 = arith.constant 1 : index
    %c0_107 = arith.constant 0 : index
    %c0_108 = arith.constant 0 : index
    %123 = vector.load %arg9[%c1_106, %c0_107, %c0_108] : memref<2x2x32xf32, #tpu.memory_space<vmem>>, vector<1x2x32xf32>
    %124 = vector.shape_cast %123 : vector<1x2x32xf32> to vector<2x32xf32>
    %125 = vector.shape_cast %119 : vector<2x32xf32> to vector<1x2x32xf32>
    tpu.vector_store %arg9[%c1_106, %c0_107, %c0_108], %125 {strides = array<i32>} : memref<2x2x32xf32, #tpu.memory_space<vmem>>, vector<1x2x32xf32>,
    return
  }
  func.func @transform_0(%arg0: i32, %arg1: i32) -> (i32, i32, i32) {
    %c0_i32 = arith.constant 0 : i32
    %c0_i32_0 = arith.constant 0 : i32
    return %arg1, %arg0, %c0_i32 : i32, i32, i32
  }
  func.func @transform_1(%arg0: i32, %arg1: i32) -> (i32, i32, i32) {
    %c0_i32 = arith.constant 0 : i32
    %c0_i32_0 = arith.constant 0 : i32
    %c0_i32_1 = arith.constant 0 : i32
    return %c0_i32, %arg0, %c0_i32_0 : i32, i32, i32
  }
  func.func @transform_2(%arg0: i32, %arg1: i32) -> (i32, i32) {
    %c0_i32 = arith.constant 0 : i32
    %c0_i32_0 = arith.constant 0 : i32
    %c0_i32_1 = arith.constant 0 : i32
    return %c0_i32, %c0_i32_0 : i32, i32
  }
  func.func @transform_3(%arg0: i32, %arg1: i32) -> (i32, i32) {
    %c0_i32 = arith.constant 0 : i32
    %c0_i32_0 = arith.constant 0 : i32
    %c0_i32_1 = arith.constant 0 : i32
    return %c0_i32, %c0_i32_0 : i32, i32
  }
  func.func @transform_4(%arg0: i32, %arg1: i32) -> (i32, i32) {
    %c0_i32 = arith.constant 0 : i32
    %c0_i32_0 = arith.constant 0 : i32
    %c0_i32_1 = arith.constant 0 : i32
    return %c0_i32, %c0_i32_0 : i32, i32
  }
  func.func @transform_5(%arg0: i32, %arg1: i32) -> (i32, i32) {
    %c0_i32 = arith.constant 0 : i32
    %c0_i32_0 = arith.constant 0 : i32
    %c0_i32_1 = arith.constant 0 : i32
    return %c0_i32, %c0_i32_0 : i32, i32
  }
  func.func @transform_6(%arg0: i32, %arg1: i32) -> (i32, i32, i32) {
    %c0_i32 = arith.constant 0 : i32
    %c0_i32_0 = arith.constant 0 : i32
    return %arg1, %arg0, %c0_i32 : i32, i32, i32
  }
  func.func @transform_7(%arg0: i32, %arg1: i32) -> (i32, i32, i32) {
    %c0_i32 = arith.constant 0 : i32
    %c0_i32_0 = arith.constant 0 : i32
    %c0_i32_1 = arith.constant 0 : i32
    return %c0_i32, %arg0, %c0_i32_0 : i32, i32, i32
  }
}

</mosaic_0001>

<bundles_post_ra>
// kernel: elman_rnn_forward.5
= control target key start
LH: loop header
LB: loop body
LE: loop exit
PB: predicated region body
PF: predicated region fallthrough
CT: control target
= control target key end

     0   :  { %vm28_vm0 = vcmask 261120   ;;  %s240_s0 = inlined_call_operand.vmem [shape: f32[16,32], index: 0, kind: input, shape index: {}]   ;;  %s241_s1 = inlined_call_operand.vmem [shape: f32[32,64], index: 1, kind: input, shape index: {}]   ;;  %s242_s2 = inlined_call_operand.vmem [shape: f32[1,64], index: 2, kind: input, shape index: {}]   ;;  %s243_s3 = inlined_call_operand.hbm [shape: f32[16,64], index: 3, kind: output, shape index: {}]  }
   0x1   :  { %v17_v0 = vld [vmem:[%s241_s1] sm:$0xff]  ;;  %v18_v1 = vld [vmem:[%s241_s1 + $0x8] sm:$0xff]  ;;  %v19_v2 = vld [vmem:[%s241_s1 + $0x10] sm:$0xff] }
   0x2   :  { %v149_v3 = vpack.c.bf16 %v18_v1, %v17_v0  ;;  %v20_v4 = vld [vmem:[%s241_s1 + $0x18] sm:$0xff]  ;;  %v15_v5 = vld [vmem:[%s240_s0] sm:$0xff] }
   0x3   :  { %v153_v6 = vpack.c.bf16 %v20_v4, %v19_v2  ;;  %146 = vmatprep.mubr.msk.f32.mxu0 %vm28_vm0, %v15_v5 }
   0x4   :  { %8 = vsyncpa [#allocation3], 0  ;;  %150 = vmatprep.subr.bf16.mxu0 %v149_v3  ;;  %v16_v7 = vld [vmem:[%s240_s0 + $0x8] sm:$0xff]  ;;  %v129_v8 = vld [vmem:[%s242_s2] ss:$0 sm:$0xff]  ;;  %s184_s1 = smov [#allocation2]  }
   0x5   :  { %152 = vmatpush3.bf16.msra.mxu0 %v149_v3  ;;  %s118_s26 = sshll.u32 %s184_s1, 4  ;;  %vm110_vm1 = vcmask 523264   ;;  %s119_s26 = int_to_ptr.vmem [resolvable:$true] %s118_s26 }
   0x6   :  { %154 = vmatprep.subr.bf16.mxu0 %v153_v6  ;;  %s160_s27 = scalar_lea.vmem %s119_s26, 256  ;;  %p165_p1 = scmp.lt.s32.totalorder %s119_s26, %s119_s26 }
   0x7   :  { %p161_p0 = scmp.ne.s32.totalorder %s119_s26, %s160_s27  ;;  %p166_p2 = scmp.lt.s32.totalorder %s160_s27, %s160_s27 }
   0x9   :  { %156 = vmatpush3.bf16.msra.mxu0 %v153_v6  ;;  %p167_p3 = por %p166_p2, %p165_p1 }
   0xb   :  { %p168_p4 = pnand %p167_p3, %p161_p0 }
   0xc   :  { %147 = vmatmul.mubr.msk.f32.vlgmr.msra.gmra.mrb[0].mxu0 %vm28_vm0, %v16_v7 }
  0xdf   :  { %v148_v9 = vpop.f32.mrb[0].mxu0 }
  0xe0   :  { %v107_v10 = vadd.f32 %v148_v9, %v129_v8  ;;  %v101_v11 = vpop.f32.mrb[1].mxu0 }
  0xe1   :  { %v102_v12 = vadd.f32 %v129_v8, %v101_v11 }
  0xe2   :  { %112 = vst.msk [vmem:[#allocation2 + $0x8] sm:$0xff] %vm110_vm1, %v107_v10 }
  0xe3   :  { %111 = vst.msk [vmem:[#allocation2] sm:$0xff] %vm110_vm1, %v102_v12 }
  0xe4   :  { %171 = shalt.err (!%p168_p4)
}
  0xe5   :  { %s172_s2 = scalar_lea.hbm %s243_s3, 256 }
  0xe6   :  { %p173_p5 = scmp.ne.s32.totalorder %s243_s3, %s172_s2  ;;  %p176_p6 = scmp.lt.u32.totalorder %s172_s2, %s243_s3 }
  0xe8   :  { %p178_p7 = pnand %p176_p6, %p173_p5 }
  0xea   :  { %181 = shalt.err (!%p178_p7)
}
  0xeb   :  { %s185_s6 = smov 128   ;;  %s186_s7 = smov 8  }
  0xec   :  { %124 = dma.vmem_to_hbm [thread:$0]  %s119_s26, 256, %s243_s3, [#allocation3], %s185_s6, %s185_s6, %s186_s7  }
  0xed   :  { %182 = dma.done.wait [#allocation3], 256  }
  0xee   :  { %183 = vsyncadd [#allocation3], 4294967040 }
  0xef   :  { %128 = vsyncpa [#allocation3], 1 }

// kernel: elman_rnn_forward.3
= control target key start
LH: loop header
LB: loop body
LE: loop exit
PB: predicated region body
PF: predicated region fallthrough
CT: control target
= control target key end

     0   :  { %vm27_vm0 = vcmask 261120   ;;  %s194_s1 = inlined_call_operand.vmem [shape: f32[32,32], index: 1, kind: input, shape index: {}]   ;;  %s195_s0 = inlined_call_operand.vmem [shape: f32[16,32], index: 0, kind: input, shape index: {}]   ;;  %s196_s2 = inlined_call_operand.vmem [shape: f32[1,32], index: 2, kind: input, shape index: {}]   ;;  %s197_s3 = inlined_call_operand.vmem [shape: f32[16,32], index: 3, kind: output, shape index: {}]  }
   0x1   :  { %v16_v0 = vld [vmem:[%s194_s1] sm:$0xff]  ;;  %v17_v1 = vld [vmem:[%s194_s1 + $0x8] sm:$0xff]  ;;  %v18_v2 = vld [vmem:[%s194_s1 + $0x10] sm:$0xff] }
   0x2   :  { %v135_v3 = vpack.c.bf16 %v17_v1, %v16_v0  ;;  %v19_v4 = vld [vmem:[%s194_s1 + $0x18] sm:$0xff]  ;;  %v14_v5 = vld [vmem:[%s195_s0] sm:$0xff]  ;;  %v15_v7 = vld [vmem:[%s195_s0 + $0x8] sm:$0xff] }
   0x3   :  { %v139_v6 = vpack.c.bf16 %v19_v4, %v18_v2  ;;  %132 = vmatprep.mubr.msk.f32.mxu0 %vm27_vm0, %v14_v5  ;;  %v115_v8 = vld [vmem:[%s196_s2] ss:$0 sm:$0xff] }
   0x4   :  { %136 = vmatprep.subr.bf16.mxu0 %v135_v3 }
   0x5   :  { %138 = vmatpush3.bf16.msra.mxu0 %v135_v3 }
   0x6   :  { %140 = vmatprep.subr.bf16.mxu0 %v139_v6 }
   0x9   :  { %142 = vmatpush3.bf16.msra.mxu0 %v139_v6 }
   0xc   :  { %133 = vmatmul.mubr.msk.f32.vlgmr.msra.gmra.mrb[0].mxu0 %vm27_vm0, %v15_v7 }
  0xdf   :  { %v134_v9 = vpop.f32.mrb[0].mxu0 }
  0xe0   :  { %v106_v10 = vadd.f32 %v134_v9, %v115_v8  ;;  %v100_v11 = vpop.f32.mrb[1].mxu0 }
  0xe1   :  { %v101_v12 = vadd.f32 %v115_v8, %v100_v11 }
  0xe2   :  { %110 = vst.msk [vmem:[%s197_s3 + $0x8] sm:$0xff] %vm27_vm0, %v106_v10 }
  0xe3   :  { %109 = vst.msk [vmem:[%s197_s3] sm:$0xff] %vm27_vm0, %v101_v12 }

// kernel: elman_rnn_forward.4
= control target key start
LH: loop header
LB: loop body
LE: loop exit
PB: predicated region body
PF: predicated region fallthrough
CT: control target
= control target key end

     0   :  { %vm31_vm0 = vcmask 254976   ;;  %v1846_v0 = vmov 0.0|0.0   ;;  %vm1847_vm1 = vmmov 0   ;;  %v1848_v4 = vmov 0.0   ;;  %s2144_s4 = inlined_call_operand.vmem [shape: f32[32,32], index: 4, kind: input, shape index: {}]   ;;  %s2145_s1 = inlined_call_operand.vmem [shape: f32[2,2,32], index: 1, kind: input, shape index: {}, may-alias: {1,7}]   ;;  %s2146_s7 = inlined_call_operand.vmem [shape: f32[2,2,32], index: 7, kind: output, shape index: {1}, may-alias: {1,7}]   ;;  %s2147_s0 = inlined_call_operand.vmem [shape: f32[8,2,32], index: 0, kind: input, shape index: {}]   ;;  %s2148_s2 = inlined_call_operand.vmem [shape: f32[32,32], index: 2, kind: input, shape index: {}]   ;;  %s2149_s5 = inlined_call_operand.vmem [shape: f32[32,32], index: 5, kind: input, shape index: {}]   ;;  %s2150_s3 = inlined_call_operand.vmem [shape: f32[1,32], index: 3, kind: input, shape index: {}]   ;;  %s2151_s6 = inlined_call_operand.vmem [shape: f32[8,2,32], index: 6, kind: output, shape index: {0}]  }
   0x1   :  { %1707 = vmatprep.subr.bf16.mxu0 %v1846_v0  ;;  %v34_v1 = vld [vmem:[%s2144_s4] sm:$0xff]  ;;  %v35_v2 = vld [vmem:[%s2144_s4 + $0x8] sm:$0xff]  ;;  %v36_v3 = vld [vmem:[%s2144_s4 + $0x10] sm:$0xff]  ;;  %1528 = vmatprep.mubr.msk.f32.mxu0 %vm1847_vm1, %v1848_v4  ;;  %vm40_vm2 = vcmask 261120  }
   0x2   :  { %v1901_v5 = vpack.c.bf16 %v35_v2, %v34_v1  ;;  %v37_v6 = vld [vmem:[%s2144_s4 + $0x18] sm:$0xff]  ;;  %v29_v7 = vld [vmem:[%s2145_s1] sm:$0x3]  ;;  %v30_v8 = vld [vmem:[%s2145_s1 + $0x2] sm:$0x3]  ;;  %1713 = vmatprep.subr.bf16.mxu1 %v1846_v0  ;;  %1539 = vmatprep.mubr.msk.f32.mxu1 %vm1847_vm1, %v1848_v4 }
   0x3   :  { %32 = vst.msk [vmem:[%s2146_s7] sm:$0x3] %vm31_vm0, %v29_v7  ;;  %33 = vst.msk [vmem:[%s2146_s7 + $0x2] sm:$0x3] %vm31_vm0, %v30_v8  ;;  %v1924_v9 = vpack.c.bf16 %v37_v6, %v36_v3  ;;  %v39_v11 = vld [vmem:[%s2147_s0] sm:$0x3] }
   0x4   :  { %1709 = vmatpush3.bf16.msra.mxu0 %v1901_v5  ;;  %1715 = vmatpush3.bf16.msra.mxu1 %v1901_v5  ;;  %v1400_v16 = vld [vmem:[%s2147_s0 + $0x2] sm:$0x3]  ;;  %v1402_v21 = vld [vmem:[%s2147_s0 + $0x4] sm:$0x3]  ;;  %v1404_v26 = vld [vmem:[%s2147_s0 + $0x6] sm:$0x3] }
   0x5   :  { %1710 = vmatprep.subr.bf16.mxu0 %v1846_v0  ;;  %1716 = vmatprep.subr.bf16.mxu1 %v1846_v0  ;;  %v1406_v31 = vld [vmem:[%s2147_s0 + $0x8] sm:$0x3]  ;;  %v1408_v36 = vld [vmem:[%s2147_s0 + $0xa] sm:$0x3]  ;;  %v1410_v42 = vld [vmem:[%s2147_s0 + $0xc] sm:$0x3] }
   0x6   :  { %v667_v47 = vld [vmem:[%s2148_s2] sm:$0xff]  ;;  %v668_v48 = vld [vmem:[%s2148_s2 + $0x8] sm:$0xff]  ;;  %v669_v50 = vld [vmem:[%s2148_s2 + $0x10] sm:$0xff] }
   0x7   :  { %v1755_v49 = vpack.c.bf16 %v668_v48, %v667_v47  ;;  %v670_v51 = vld [vmem:[%s2148_s2 + $0x18] sm:$0xff]  ;;  %v761_v53 = vld [vmem:[%s2149_s5] sm:$0xff]  ;;  %v762_v54 = vld [vmem:[%s2149_s5 + $0x8] sm:$0xff] }
   0x8   :  { %1712 = vmatpush3.bf16.msra.mxu0 %v1924_v9  ;;  %1718 = vmatpush3.bf16.msra.mxu1 %v1924_v9  ;;  %v1759_v52 = vpack.c.bf16 %v670_v51, %v669_v50  ;;  %v763_v55 = vld [vmem:[%s2149_s5 + $0x10] sm:$0xff]  ;;  %v2032_v56 = vpack.c.bf16 %v762_v54, %v761_v53  ;;  %v764_v57 = vld [vmem:[%s2149_s5 + $0x18] sm:$0xff]  ;;  %v1412_v60 = vld [vmem:[%s2147_s0 + $0xe] sm:$0x3] }
   0x9   :  { %1719 = vmatprep.subr.bf16.mxu0 %v1846_v0  ;;  %1725 = vmatprep.subr.bf16.mxu1 %v1846_v0  ;;  %v2038_v58 = vpack.c.bf16 %v764_v57, %v763_v55  ;;  %v1414_v6 = vld [vmem:[%s2150_s3] ss:$0 sm:$0xff] }
   0xa   :  { %v38_v10 = vld [vmem:[%s2146_s7] sm:$0x3]  ;;  %v1417_v59 = vld [vmem:[%s2146_s7 + $0x2] sm:$0x3] }
   0xb   :  { %1529 = vmatmul.mubr.msk.f32.vlgmr.msra.gmra.mrb[0].mxu0 %vm40_vm2, %v38_v10 }
   0xc   :  { %1721 = vmatpush3.bf16.msra.mxu0 %v1901_v5  ;;  %1550 = vmatprep.mubr.msk.f32.mxu0 %vm1847_vm1, %v1848_v4 }
   0xd   :  { %1722 = vmatprep.subr.bf16.mxu0 %v1846_v0 }
  0x10   :  { %1724 = vmatpush3.bf16.msra.mxu0 %v1924_v9 }
  0x11   :  { %1731 = vmatprep.subr.bf16.mxu0 %v1846_v0 }
  0xde   :  { %v110_v12 = vpop.f32.mrb[0].mxu0 }
  0xdf   :  { %v114_v13 = vadd.f32 %v110_v12, %v39_v11  ;;  %v1530_v14 = vpop.f32.mrb[1].mxu0 }
  0xe1   :  { %1814 = vtanh.f32 %v114_v13 }
  0xeb   :  { %v1815_v15 = vpop.eup %1814 }
  0xec   :  { %117 = vst.msk [vmem:[#allocation2] sm:$0x3] %vm31_vm0, %v1815_v15  ;;  %1540 = vmatmul.mubr.msk.f32.vlgmr.msra.gmra.mrb[0].mxu1 %vm40_vm2, %v1815_v15 }
  0xed   :  { %1727 = vmatpush3.bf16.msra.mxu1 %v1901_v5  ;;  %1561 = vmatprep.mubr.msk.f32.mxu1 %vm1847_vm1, %v1848_v4 }
  0xee   :  { %1728 = vmatprep.subr.bf16.mxu1 %v1846_v0 }
  0xf1   :  { %1730 = vmatpush3.bf16.msra.mxu1 %v1924_v9 }
  0xf2   :  { %1737 = vmatprep.subr.bf16.mxu1 %v1846_v0 }
 0x1bf   :  { %v189_v17 = vpop.f32.mrb[0].mxu1 }
 0x1c0   :  { %v193_v18 = vadd.f32 %v1400_v16, %v189_v17  ;;  %v1541_v19 = vpop.f32.mrb[1].mxu1 }
 0x1c2   :  { %1816 = vtanh.f32 %v193_v18 }
 0x1cc   :  { %v1817_v20 = vpop.eup %1816 }
 0x1cd   :  { %195 = vst.msk [vmem:[#allocation2 + $0x2] sm:$0x3] %vm31_vm0, %v1817_v20  ;;  %1551 = vmatmul.mubr.msk.f32.vlgmr.msra.gmra.mrb[2].mxu0 %vm40_vm2, %v1817_v20 }
 0x1ce   :  { %1733 = vmatpush3.bf16.msra.mxu0 %v1901_v5  ;;  %1572 = vmatprep.mubr.msk.f32.mxu0 %vm1847_vm1, %v1848_v4 }
 0x1cf   :  { %1734 = vmatprep.subr.bf16.mxu0 %v1846_v0 }
 0x1d2   :  { %1736 = vmatpush3.bf16.msra.mxu0 %v1924_v9 }
 0x1d3   :  { %1743 = vmatprep.subr.bf16.mxu0 %v1846_v0 }
 0x2a0   :  { %v267_v22 = vpop.f32.mrb[2].mxu0 }
 0x2a1   :  { %v271_v23 = vadd.f32 %v1402_v21, %v267_v22  ;;  %v1552_v24 = vpop.f32.mrb[3].mxu0 }
 0x2a3   :  { %1818 = vtanh.f32 %v271_v23 }
 0x2ad   :  { %v1819_v25 = vpop.eup %1818 }
 0x2ae   :  { %273 = vst.msk [vmem:[#allocation2 + $0x4] sm:$0x3] %vm31_vm0, %v1819_v25  ;;  %1562 = vmatmul.mubr.msk.f32.vlgmr.msra.gmra.mrb[2].mxu1 %vm40_vm2, %v1819_v25 }
 0x2af   :  { %1739 = vmatpush3.bf16.msra.mxu1 %v1901_v5  ;;  %1583 = vmatprep.mubr.msk.f32.mxu1 %vm1847_vm1, %v1848_v4 }
 0x2b0   :  { %1740 = vmatprep.subr.bf16.mxu1 %v1846_v0 }
 0x2b3   :  { %1742 = vmatpush3.bf16.msra.mxu1 %v1924_v9 }
 0x2b4   :  { %1749 = vmatprep.subr.bf16.mxu1 %v1846_v0 }
 0x381   :  { %v345_v27 = vpop.f32.mrb[2].mxu1 }
 0x382   :  { %v349_v28 = vadd.f32 %v1404_v26, %v345_v27  ;;  %v1563_v29 = vpop.f32.mrb[3].mxu1 }
 0x384   :  { %1820 = vtanh.f32 %v349_v28 }
 0x38e   :  { %v1821_v30 = vpop.eup %1820 }
 0x38f   :  { %351 = vst.msk [vmem:[#allocation2 + $0x6] sm:$0x3] %vm31_vm0, %v1821_v30  ;;  %1573 = vmatmul.mubr.msk.f32.vlgmr.msra.gmra.mrb[4].mxu0 %vm40_vm2, %v1821_v30 }
 0x390   :  { %1745 = vmatpush3.bf16.msra.mxu0 %v1901_v5  ;;  %1594 = vmatprep.mubr.msk.f32.mxu0 %vm1847_vm1, %v1848_v4 }
 0x391   :  { %1746 = vmatprep.subr.bf16.mxu0 %v1846_v0 }
 0x394   :  { %1748 = vmatpush3.bf16.msra.mxu0 %v1924_v9 }
 0x395   :  { %1756 = vmatprep.subr.bf16.mxu0 %v1755_v49 }
 0x396   :  { %v665_v41 = vld [vmem:[#allocation2] sm:$0xff] }
 0x462   :  { %v423_v32 = vpop.f32.mrb[4].mxu0 }
 0x463   :  { %v427_v33 = vadd.f32 %v1406_v31, %v423_v32  ;;  %v1574_v34 = vpop.f32.mrb[5].mxu0 }
 0x465   :  { %1822 = vtanh.f32 %v427_v33 }
 0x46f   :  { %v1823_v35 = vpop.eup %1822 }
 0x470   :  { %429 = vst.msk [vmem:[#allocation2 + $0x8] sm:$0x3] %vm31_vm0, %v1823_v35  ;;  %1584 = vmatmul.mubr.msk.f32.vlgmr.msra.gmra.mrb[4].mxu1 %vm40_vm2, %v1823_v35 }
 0x471   :  { %1751 = vmatpush3.bf16.msra.mxu1 %v1901_v5  ;;  %1605 = vmatprep.mubr.msk.f32.mxu1 %vm1847_vm1, %v1848_v4 }
 0x472   :  { %1752 = vmatprep.subr.bf16.mxu1 %v1846_v0 }
 0x475   :  { %1754 = vmatpush3.bf16.msra.mxu1 %v1924_v9 }
 0x476   :  { %1763 = vmatprep.subr.bf16.mxu1 %v1846_v0 }
 0x543   :  { %v501_v37 = vpop.f32.mrb[4].mxu1 }
 0x544   :  { %v505_v38 = vadd.f32 %v1408_v36, %v501_v37  ;;  %v1585_v39 = vpop.f32.mrb[5].mxu1 }
 0x546   :  { %1824 = vtanh.f32 %v505_v38 }
 0x550   :  { %v1825_v40 = vpop.eup %1824 }
 0x551   :  { %507 = vst.msk [vmem:[#allocation2 + $0xa] sm:$0x3] %vm31_vm0, %v1825_v40  ;;  %1595 = vmatmul.mubr.msk.f32.vlgmr.msra.gmra.mrb[6].mxu0 %vm40_vm2, %v1825_v40 }
 0x552   :  { %1616 = vmatprep.mubr.msk.f32.mxu0 %vm40_vm2, %v665_v41  ;;  %1758 = vmatpush3.bf16.msra.mxu0 %v1755_v49 }
 0x553   :  { %1760 = vmatprep.subr.bf16.mxu0 %v1759_v52 }
 0x556   :  { %1762 = vmatpush3.bf16.msra.mxu0 %v1759_v52 }
 0x557   :  { %1769 = vmatprep.subr.bf16.mxu0 %v1846_v0 }
 0x624   :  { %v579_v43 = vpop.f32.mrb[6].mxu0 }
 0x625   :  { %v583_v44 = vadd.f32 %v1410_v42, %v579_v43  ;;  %v1596_v45 = vpop.f32.mrb[7].mxu0 }
 0x627   :  { %1826 = vtanh.f32 %v583_v44 }
 0x631   :  { %v1827_v46 = vpop.eup %1826 }
 0x632   :  { %585 = vst.msk [vmem:[#allocation2 + $0xc] sm:$0x3] %vm31_vm0, %v1827_v46  ;;  %1606 = vmatmul.mubr.msk.f32.vlgmr.msra.gmra.mrb[6].mxu1 %vm40_vm2, %v1827_v46 }
 0x633   :  { %1627 = vmatprep.mubr.msk.f32.mxu1 %vm1847_vm1, %v1848_v4  ;;  %1765 = vmatpush3.bf16.msra.mxu1 %v2032_v56 }
 0x634   :  { %1766 = vmatprep.subr.bf16.mxu1 %v1846_v0 }
 0x637   :  { %1768 = vmatpush3.bf16.msra.mxu1 %v2038_v58 }
 0x638   :  { %1775 = vmatprep.subr.bf16.mxu1 %v1846_v0 }
 0x63a   :  { %1628 = vmatmul.mubr.msk.f32.vlgmr.msra.gmra.mrb[8].mxu1 %vm40_vm2, %v1417_v59 }
 0x63b   :  { %1777 = vmatpush3.bf16.msra.mxu1 %v2032_v56  ;;  %1649 = vmatprep.mubr.msk.f32.mxu1 %vm1847_vm1, %v1848_v4 }
 0x63c   :  { %1778 = vmatprep.subr.bf16.mxu1 %v1846_v0 }
 0x63f   :  { %1780 = vmatpush3.bf16.msra.mxu1 %v2038_v58 }
 0x640   :  { %1787 = vmatprep.subr.bf16.mxu1 %v1846_v0 }
 0x705   :  { %v657_v61 = vpop.f32.mrb[6].mxu1 }
 0x706   :  { %v661_v62 = vadd.f32 %v1412_v60, %v657_v61  ;;  %v1607_v63 = vpop.f32.mrb[7].mxu1 }
 0x708   :  { %1828 = vtanh.f32 %v661_v62 }
 0x70d   :  { %v837_v3 = vpop.f32.mrb[8].mxu1 }
 0x70e   :  { %v1629_v5 = vpop.f32.mrb[9].mxu1 }
 0x712   :  { %v1829_v1 = vpop.eup %1828 }
 0x713   :  { %663 = vst.msk [vmem:[#allocation2 + $0xe] sm:$0x3] %vm31_vm0, %v1829_v1  ;;  %664 = vst.msk [vmem:[%s2146_s7] sm:$0x3] %vm31_vm0, %v1829_v1 }
 0x71a   :  { %v666_v2 = vld [vmem:[#allocation2 + $0x8] sm:$0xff] }
 0x71b   :  { %1617 = vmatmul.mubr.msk.f32.vlgmr.msra.gmra.mrb[8].mxu0 %vm40_vm2, %v666_v2 }
 0x71c   :  { %1771 = vmatpush3.bf16.msra.mxu0 %v2032_v56  ;;  %1638 = vmatprep.mubr.msk.f32.mxu0 %vm1847_vm1, %v1848_v4 }
 0x71d   :  { %1772 = vmatprep.subr.bf16.mxu0 %v1846_v0 }
 0x720   :  { %1774 = vmatpush3.bf16.msra.mxu0 %v2038_v58 }
 0x721   :  { %1781 = vmatprep.subr.bf16.mxu0 %v1846_v0 }
 0x7ee   :  { %v1618_v7 = vpop.f32.mrb[8].mxu0 }
 0x7ef   :  { %v756_v8 = vadd.f32 %v1618_v7, %v1414_v6  ;;  %v750_v9 = vpop.f32.mrb[9].mxu0 }
 0x7f0   :  { %v751_v10 = vadd.f32 %v1414_v6, %v750_v9 }
 0x7f1   :  { %760 = vst.msk [vmem:[#allocation3 + $0x8] sm:$0xff] %vm40_vm2, %v756_v8 }
 0x7f2   :  { %759 = vst.msk [vmem:[#allocation3] sm:$0xff] %vm40_vm2, %v751_v10 }
 0x7f8   :  { %v1078_v29 = vld [vmem:[#allocation3 + $0x8] sm:$0x3]  ;;  %v1156_v34 = vld [vmem:[#allocation3 + $0xa] sm:$0x3]  ;;  %v1234_v39 = vld [vmem:[#allocation3 + $0xc] sm:$0x3] }
 0x7f9   :  { %v767_v11 = vld [vmem:[#allocation3] sm:$0x3]  ;;  %v844_v14 = vld [vmem:[#allocation3 + $0x2] sm:$0x3]  ;;  %v922_v19 = vld [vmem:[#allocation3 + $0x4] sm:$0x3] }
 0x7fa   :  { %v841_v12 = vadd.f32 %v837_v3, %v767_v11  ;;  %v1000_v24 = vld [vmem:[#allocation3 + $0x6] sm:$0x3]  ;;  %v1312_v42 = vld [vmem:[#allocation3 + $0xe] sm:$0x3] }
 0x7fc   :  { %1830 = vtanh.f32 %v841_v12 }
 0x806   :  { %v1831_v13 = vpop.eup %1830 }
 0x807   :  { %843 = vst.msk [vmem:[%s2151_s6] sm:$0x3] %vm31_vm0, %v1831_v13  ;;  %1639 = vmatmul.mubr.msk.f32.vlgmr.msra.gmra.mrb[10].mxu0 %vm40_vm2, %v1831_v13 }
 0x808   :  { %1783 = vmatpush3.bf16.msra.mxu0 %v2032_v56  ;;  %1660 = vmatprep.mubr.msk.f32.mxu0 %vm1847_vm1, %v1848_v4 }
 0x809   :  { %1784 = vmatprep.subr.bf16.mxu0 %v1846_v0 }
 0x80c   :  { %1786 = vmatpush3.bf16.msra.mxu0 %v2038_v58 }
 0x80d   :  { %1793 = vmatprep.subr.bf16.mxu0 %v1846_v0 }
 0x8da   :  { %v914_v15 = vpop.f32.mrb[10].mxu0 }
 0x8db   :  { %v918_v16 = vadd.f32 %v914_v15, %v844_v14  ;;  %v1640_v17 = vpop.f32.mrb[11].mxu0 }
 0x8dd   :  { %1832 = vtanh.f32 %v918_v16 }
 0x8e7   :  { %v1833_v18 = vpop.eup %1832 }
 0x8e8   :  { %1420 = vst.msk [vmem:[%s2151_s6 + $0x2] sm:$0x3] %vm31_vm0, %v1833_v18  ;;  %1650 = vmatmul.mubr.msk.f32.vlgmr.msra.gmra.mrb[10].mxu1 %vm40_vm2, %v1833_v18 }
 0x8e9   :  { %1789 = vmatpush3.bf16.msra.mxu1 %v2032_v56  ;;  %1671 = vmatprep.mubr.msk.f32.mxu1 %vm1847_vm1, %v1848_v4 }
 0x8ea   :  { %1790 = vmatprep.subr.bf16.mxu1 %v1846_v0 }
 0x8ed   :  { %1792 = vmatpush3.bf16.msra.mxu1 %v2038_v58 }
 0x8ee   :  { %1799 = vmatprep.subr.bf16.mxu1 %v1846_v0 }
 0x9bb   :  { %v992_v20 = vpop.f32.mrb[10].mxu1 }
 0x9bc   :  { %v996_v21 = vadd.f32 %v992_v20, %v922_v19  ;;  %v1651_v22 = vpop.f32.mrb[11].mxu1 }
 0x9be   :  { %1834 = vtanh.f32 %v996_v21 }
 0x9c8   :  { %v1835_v23 = vpop.eup %1834 }
 0x9c9   :  { %1422 = vst.msk [vmem:[%s2151_s6 + $0x4] sm:$0x3] %vm31_vm0, %v1835_v23  ;;  %1661 = vmatmul.mubr.msk.f32.vlgmr.msra.gmra.mrb[12].mxu0 %vm40_vm2, %v1835_v23 }
 0x9ca   :  { %1795 = vmatpush3.bf16.msra.mxu0 %v2032_v56  ;;  %1682 = vmatprep.mubr.msk.f32.mxu0 %vm1847_vm1, %v1848_v4 }
 0x9cb   :  { %1796 = vmatprep.subr.bf16.mxu0 %v1846_v0 }
 0x9ce   :  { %1798 = vmatpush3.bf16.msra.mxu0 %v2038_v58 }
 0x9cf   :  { %1805 = vmatprep.subr.bf16.mxu0 %v1846_v0 }
 0xa9c   :  { %v1070_v25 = vpop.f32.mrb[12].mxu0 }
 0xa9d   :  { %v1074_v26 = vadd.f32 %v1070_v25, %v1000_v24  ;;  %v1662_v27 = vpop.f32.mrb[13].mxu0 }
 0xa9f   :  { %1836 = vtanh.f32 %v1074_v26 }
 0xaa9   :  { %v1837_v28 = vpop.eup %1836 }
 0xaaa   :  { %1424 = vst.msk [vmem:[%s2151_s6 + $0x6] sm:$0x3] %vm31_vm0, %v1837_v28  ;;  %1672 = vmatmul.mubr.msk.f32.vlgmr.msra.gmra.mrb[12].mxu1 %vm40_vm2, %v1837_v28 }
 0xaab   :  { %1801 = vmatpush3.bf16.msra.mxu1 %v2032_v56  ;;  %1693 = vmatprep.mubr.msk.f32.mxu1 %vm1847_vm1, %v1848_v4 }
 0xaac   :  { %1802 = vmatprep.subr.bf16.mxu1 %v1846_v0 }
 0xaaf   :  { %1804 = vmatpush3.bf16.msra.mxu1 %v2038_v58 }
 0xb7d   :  { %v1148_v30 = vpop.f32.mrb[12].mxu1 }
 0xb7e   :  { %v1152_v31 = vadd.f32 %v1148_v30, %v1078_v29  ;;  %v1673_v32 = vpop.f32.mrb[13].mxu1 }
 0xb80   :  { %1838 = vtanh.f32 %v1152_v31 }
 0xb8a   :  { %v1839_v33 = vpop.eup %1838 }
 0xb8b   :  { %1426 = vst.msk [vmem:[%s2151_s6 + $0x8] sm:$0x3] %vm31_vm0, %v1839_v33  ;;  %1683 = vmatmul.mubr.msk.f32.vlgmr.msra.gmra.mrb[14].mxu0 %vm40_vm2, %v1839_v33 }
 0xb8c   :  { %1807 = vmatpush3.bf16.msra.mxu0 %v2032_v56  ;;  %1704 = vmatprep.mubr.msk.f32.mxu0 %vm1847_vm1, %v1848_v4 }
 0xb8d   :  { %1808 = vmatprep.subr.bf16.mxu0 %v1846_v0 }
 0xb90   :  { %1810 = vmatpush3.bf16.msra.mxu0 %v2038_v58 }
 0xc5e   :  { %v1226_v35 = vpop.f32.mrb[14].mxu0 }
 0xc5f   :  { %v1230_v36 = vadd.f32 %v1226_v35, %v1156_v34  ;;  %v1684_v37 = vpop.f32.mrb[15].mxu0 }
 0xc61   :  { %1840 = vtanh.f32 %v1230_v36 }
 0xc6b   :  { %v1841_v38 = vpop.eup %1840 }
 0xc6c   :  { %1428 = vst.msk [vmem:[%s2151_s6 + $0xa] sm:$0x3] %vm31_vm0, %v1841_v38  ;;  %1694 = vmatmul.mubr.msk.f32.vlgmr.msra.gmra.mrb[14].mxu1 %vm40_vm2, %v1841_v38 }
 0xd3f   :  { %v1304_v40 = vpop.f32.mrb[14].mxu1 }
 0xd40   :  { %v1308_v4 = vadd.f32 %v1304_v40, %v1234_v39  ;;  %v1695_v41 = vpop.f32.mrb[15].mxu1 }
 0xd42   :  { %1842 = vtanh.f32 %v1308_v4 }
 0xd4c   :  { %v1843_v0 = vpop.eup %1842 }
 0xd4d   :  { %1430 = vst.msk [vmem:[%s2151_s6 + $0xc] sm:$0x3] %vm31_vm0, %v1843_v0  ;;  %1705 = vmatmul.mubr.msk.f32.vlgmr.msra.gmra.mrb[16].mxu0 %vm40_vm2, %v1843_v0 }
 0xe20   :  { %v1382_v43 = vpop.f32.mrb[16].mxu0 }
 0xe21   :  { %v1386_v44 = vadd.f32 %v1382_v43, %v1312_v42  ;;  %v1706_v45 = vpop.f32.mrb[17].mxu0 }
 0xe23   :  { %1844 = vtanh.f32 %v1386_v44 }
 0xe2d   :  { %v1845_v46 = vpop.eup %1844 }
 0xe2e   :  { %1432 = vst.msk [vmem:[%s2151_s6 + $0xe] sm:$0x3] %vm31_vm0, %v1845_v46  ;;  %1433 = vst.msk [vmem:[%s2146_s7 + $0x2] sm:$0x3] %vm31_vm0, %v1845_v46 }

</bundles_post_ra>
